<compile_context>
chip_gen: v7x
topology: tpu7x:2x2x1
jax: 0.10.0
libtpu: 0.0.40
codegen_flags: <defaults>
</compile_context>

<pallas_src>
import jax
import jax.numpy as jnp
from jax.experimental import pallas as pl
from jax.experimental.pallas import tpu as pltpu

_MAX_TB = 2048        # max tokens (output rows) per grid step; multiple of 8 and 256
_SELECT_CHUNK = 8     # rows per inner select step (one f32 output vreg for D=128)
_ONEHOT_CHUNK = 256   # rows per MXU one-hot matmul


def _embedding_select_kernel(idx_ref, table_ref, out_ref):
    """Select-gather: out[i, :] = table[idx[i]] via V-1 full-width selects.

    idx_ref   : VMEM (TB, 1) int32
    table_ref : VMEM (V, D)
    out_ref   : VMEM (TB, D)
    """
    tb, d = out_ref.shape
    num_rows = table_ref.shape[0]

    # Hoisted once per tile: table in f32 + every row splatted to chunk height.
    table_f32 = table_ref[...].astype(jnp.float32)                     # (V, D)
    chunk = min(_SELECT_CHUNK, tb)
    rows = [jnp.broadcast_to(table_f32[v:v + 1, :], (chunk, d))
            for v in range(num_rows)]                                   # V x (chunk, D)

    n_chunks = tb // chunk

    def body(c, carry):
        c0 = pl.multiple_of(c * chunk, chunk)
        idx_c = idx_ref[pl.ds(c0, chunk), :]                            # (chunk, 1)
        idx_b = jnp.broadcast_to(idx_c, (chunk, d))                     # one lane splat
        acc = rows[0]                                   # idx==0 / OOB -> padding row
        for v in range(1, num_rows):
            acc = jnp.where(idx_b == v, rows[v], acc)
        out_ref[pl.ds(c0, chunk), :] = acc.astype(out_ref.dtype)
        return carry

    jax.lax.fori_loop(0, n_chunks, body, 0, unroll=min(4, n_chunks))


def _embedding_onehot_kernel(idx_ref, table_ref, out_ref):
    """MXU gather: out = one_hot(idx) @ table (table rows zero-padded to V_pad).

    idx_ref   : VMEM (TB, 1) int32
    table_ref : VMEM (V_pad, D)  with V_pad % 128 == 0, rows >= V are zero
    out_ref   : VMEM (TB, D)
    """
    tb, d = out_ref.shape
    v_pad = table_ref.shape[0]
    table = table_ref[...]                                              # (V_pad, D)

    chunk = min(_ONEHOT_CHUNK, tb)
    n_chunks = tb // chunk

    def body(c, carry):
        c0 = pl.multiple_of(c * chunk, chunk)
        idx_c = idx_ref[pl.ds(c0, chunk), :]                            # (chunk, 1)
        idx_b = jnp.broadcast_to(idx_c, (chunk, v_pad))                 # hoisted splat
        lanes = jax.lax.broadcasted_iota(jnp.int32, (chunk, v_pad), 1)
        one_hot = (lanes == idx_b).astype(table.dtype)                  # exact 0/1
        acc = jnp.dot(one_hot, table, preferred_element_type=jnp.float32)
        out_ref[pl.ds(c0, chunk), :] = acc.astype(out_ref.dtype)
        return carry

    jax.lax.fori_loop(0, n_chunks, body, 0)


def _round_up(x, m):
    return ((x + m - 1) // m) * m


@jax.jit
def constraint_embedding_forward(constraint_idx, table):
    """Equivalent of ConstraintEmbedding.forward: table[constraint_idx]."""
    orig_shape = constraint_idx.shape
    num_rows, d = table.shape

    flat_idx = constraint_idx.reshape(-1).astype(jnp.int32)
    n = flat_idx.shape[0]

    # bf16 tables -> MXU one-hot gather (exact for bf16); others -> select chain.
    # TODO(synk): enable the one-hot MXU path for f32 tables once the f32-via-MXU
    # path is verified bit-exact for pure one-hot operands.
    use_mxu = table.dtype == jnp.bfloat16
    chunk = _ONEHOT_CHUNK if use_mxu else _SELECT_CHUNK

    # Pad only to a sublane multiple (<= 7 wasted rows); ragged last grid block
    # (if any) is clamped by Pallas -> no TB-sized padding, no big output slice.
    n_pad = _round_up(max(n, 1), 8)
    if n_pad != n:
        flat_idx = jnp.pad(flat_idx, (0, n_pad - n))    # pad idx 0 -> padding row
    idx_col = flat_idx.reshape(n_pad, 1)

    # Tile: big enough to amortize ~0.35us/step pipeline overhead, capped so
    # mid-sized inputs still give >= 2 grid steps (both v7x TensorCores busy).
    tb = max(chunk, min(_MAX_TB, _round_up(pl.cdiv(n_pad, 2), chunk)))
    grid = pl.cdiv(n_pad, tb)

    if use_mxu:
        kernel = _embedding_onehot_kernel
        v_pad = _round_up(num_rows, 128)
        table_in = jnp.pad(table, ((0, v_pad - num_rows), (0, 0)))
        flops = 2 * n_pad * v_pad * d
    else:
        kernel = _embedding_select_kernel
        v_pad = num_rows
        table_in = table
        flops = 2 * n_pad * d * max(num_rows - 1, 1)

    dsize = jnp.dtype(table.dtype).itemsize
    cost = pl.CostEstimate(
        flops=int(flops),
        transcendentals=0,
        bytes_accessed=int(n_pad * d * dsize + n_pad * 4 + v_pad * d * dsize),
    )

    out_flat = pl.pallas_call(
        kernel,
        out_shape=jax.ShapeDtypeStruct((n_pad, d), table.dtype),
        grid=(grid,),
        in_specs=[
            pl.BlockSpec((tb, 1), lambda i: (i, 0)),       # indices (VMEM)
            pl.BlockSpec((v_pad, d), lambda i: (0, 0)),    # full tiny table, resident
        ],
        out_specs=pl.BlockSpec((tb, d), lambda i: (i, 0)),
        compiler_params=pltpu.CompilerParams(
            dimension_semantics=("parallel",),             # independent output tiles
        ),
        cost_estimate=cost,
    )(idx_col, table_in)

    if n_pad != n:
        out_flat = out_flat[:n]                            # at most 7 rows
    return out_flat.reshape(*orig_shape, d)


def make_embedding_table(key, num_constraints, embedding_dim, dtype=jnp.float32):
    """Init mirroring torch.nn.Embedding(num_constraints + 2, D, padding_idx=0)."""
    num_rows = num_constraints + 2
    table = jax.random.normal(key, (num_rows, embedding_dim), dtype=dtype)
    return table.at[0].set(0.0)   # padding_idx=0 -> row 0 is all zeros


if __name__ == "__main__":
    key = jax.random.PRNGKey(0)
    k_table, k_idx = jax.random.split(key)

    num_constraints = 10
    embedding_dim = 128
    batch, seq = 2, 8

    table = make_embedding_table(k_table, num_constraints, embedding_dim)
    constraint_idx = jax.random.randint(
        k_idx, (batch, seq), minval=0, maxval=num_constraints + 2, dtype=jnp.int32
    )

    # f32 table -> select-gather path.
    out = jax.block_until_ready(constraint_embedding_forward(constraint_idx, table))
    ref = table[constraint_idx]
    assert out.shape == (batch, seq, embedding_dim)
    assert jnp.allclose(out, ref), "Pallas select-gather mismatch (f32)"
    assert bool(jnp.all(jnp.where(constraint_idx[..., None] == 0, out, 0.0) == 0.0))

    # bf16 table -> MXU one-hot gather path.
    table_bf16 = table.astype(jnp.bfloat16)
    out_bf = jax.block_until_ready(
        constraint_embedding_forward(constraint_idx, table_bf16))
    ref_bf = table_bf16[constraint_idx]
    assert jnp.allclose(out_bf.astype(jnp.float32), ref_bf.astype(jnp.float32)), \
        "Pallas one-hot MXU gather mismatch (bf16)"

    # Ragged-N case (N not a multiple of the tile) exercises grid clamping.
    idx2 = jax.random.randint(
        jax.random.PRNGKey(1), (3, 7), minval=0, maxval=num_constraints + 2,
        dtype=jnp.int32)
    out2 = jax.block_until_ready(constraint_embedding_forward(idx2, table))
    assert jnp.allclose(out2, table[idx2]), "Pallas ragged-N gather mismatch"

    print("KERNEL_OK")
</pallas_src>

<mosaic_0001>
module attributes {stable_mosaic.version = 11 : i64} {
  func.func @_embedding_select_kernel(%arg0: i32, %arg1: memref<8x1xi32, #tpu.memory_space<vmem>>, %arg2: memref<12x128xf32, #tpu.memory_space<vmem>>, %arg3: memref<8x128xf32, #tpu.memory_space<vmem>>) attributes {dimension_semantics = [#tpu.dimension_semantics<parallel>], iteration_bounds = array<i64: 2>, scalar_prefetch = 0 : i64, scratch_operands = 0 : i64, tpu.core_type = #tpu.core_type<tc>, window_params = [{transform_indices = @transform_0, window_bounds = array<i64: 8, 1>}, {pipeline_mode = #tpu.pipeline_mode<synchronous>, transform_indices = @transform_1, window_bounds = array<i64: 12, 128>}, {transform_indices = @transform_2, window_bounds = array<i64: 8, 128>}]} {
    %c0 = arith.constant 0 : index
    %c0_0 = arith.constant 0 : index
    %0 = vector.load %arg2[%c0, %c0_0] : memref<12x128xf32, #tpu.memory_space<vmem>>, vector<12x128xf32>
    %1 = vector.extract_strided_slice %0 {offsets = [0, 0], sizes = [1, 128], strides = [1, 1]} : vector<12x128xf32> to vector<1x128xf32>
    %2 = vector.shape_cast %1 : vector<1x128xf32> to vector<1x128xf32>
    %3 = vector.broadcast %2 : vector<1x128xf32> to vector<8x128xf32>
    %4 = vector.extract_strided_slice %0 {offsets = [1, 0], sizes = [1, 128], strides = [1, 1]} : vector<12x128xf32> to vector<1x128xf32>
    %5 = vector.shape_cast %4 : vector<1x128xf32> to vector<1x128xf32>
    %6 = vector.broadcast %5 : vector<1x128xf32> to vector<8x128xf32>
    %7 = vector.extract_strided_slice %0 {offsets = [2, 0], sizes = [1, 128], strides = [1, 1]} : vector<12x128xf32> to vector<1x128xf32>
    %8 = vector.shape_cast %7 : vector<1x128xf32> to vector<1x128xf32>
    %9 = vector.broadcast %8 : vector<1x128xf32> to vector<8x128xf32>
    %10 = vector.extract_strided_slice %0 {offsets = [3, 0], sizes = [1, 128], strides = [1, 1]} : vector<12x128xf32> to vector<1x128xf32>
    %11 = vector.shape_cast %10 : vector<1x128xf32> to vector<1x128xf32>
    %12 = vector.broadcast %11 : vector<1x128xf32> to vector<8x128xf32>
    %13 = vector.extract_strided_slice %0 {offsets = [4, 0], sizes = [1, 128], strides = [1, 1]} : vector<12x128xf32> to vector<1x128xf32>
    %14 = vector.shape_cast %13 : vector<1x128xf32> to vector<1x128xf32>
    %15 = vector.broadcast %14 : vector<1x128xf32> to vector<8x128xf32>
    %16 = vector.extract_strided_slice %0 {offsets = [5, 0], sizes = [1, 128], strides = [1, 1]} : vector<12x128xf32> to vector<1x128xf32>
    %17 = vector.shape_cast %16 : vector<1x128xf32> to vector<1x128xf32>
    %18 = vector.broadcast %17 : vector<1x128xf32> to vector<8x128xf32>
    %19 = vector.extract_strided_slice %0 {offsets = [6, 0], sizes = [1, 128], strides = [1, 1]} : vector<12x128xf32> to vector<1x128xf32>
    %20 = vector.shape_cast %19 : vector<1x128xf32> to vector<1x128xf32>
    %21 = vector.broadcast %20 : vector<1x128xf32> to vector<8x128xf32>
    %22 = vector.extract_strided_slice %0 {offsets = [7, 0], sizes = [1, 128], strides = [1, 1]} : vector<12x128xf32> to vector<1x128xf32>
    %23 = vector.shape_cast %22 : vector<1x128xf32> to vector<1x128xf32>
    %24 = vector.broadcast %23 : vector<1x128xf32> to vector<8x128xf32>
    %25 = vector.extract_strided_slice %0 {offsets = [8, 0], sizes = [1, 128], strides = [1, 1]} : vector<12x128xf32> to vector<1x128xf32>
    %26 = vector.shape_cast %25 : vector<1x128xf32> to vector<1x128xf32>
    %27 = vector.broadcast %26 : vector<1x128xf32> to vector<8x128xf32>
    %28 = vector.extract_strided_slice %0 {offsets = [9, 0], sizes = [1, 128], strides = [1, 1]} : vector<12x128xf32> to vector<1x128xf32>
    %29 = vector.shape_cast %28 : vector<1x128xf32> to vector<1x128xf32>
    %30 = vector.broadcast %29 : vector<1x128xf32> to vector<8x128xf32>
    %31 = vector.extract_strided_slice %0 {offsets = [10, 0], sizes = [1, 128], strides = [1, 1]} : vector<12x128xf32> to vector<1x128xf32>
    %32 = vector.shape_cast %31 : vector<1x128xf32> to vector<1x128xf32>
    %33 = vector.broadcast %32 : vector<1x128xf32> to vector<8x128xf32>
    %34 = vector.extract_strided_slice %0 {offsets = [11, 0], sizes = [1, 128], strides = [1, 1]} : vector<12x128xf32> to vector<1x128xf32>
    %35 = vector.shape_cast %34 : vector<1x128xf32> to vector<1x128xf32>
    %36 = vector.broadcast %35 : vector<1x128xf32> to vector<8x128xf32>
    %c0_i32 = arith.constant 0 : i32
    %c8_i32 = arith.constant 8 : i32
    %37 = arith.muli %c0_i32, %c8_i32 : i32
    %38 = tpu.assume_multiple %37, 8 : i32
    %39 = arith.index_cast %38 : i32 to index
    %c0_1 = arith.constant 0 : index
    %40 = vector.load %arg1[%39, %c0_1] : memref<8x1xi32, #tpu.memory_space<vmem>>, vector<8x1xi32>
    %41 = vector.shape_cast %40 : vector<8x1xi32> to vector<8x1xi32>
    %42 = vector.broadcast %41 : vector<8x1xi32> to vector<8x128xi32>
    %c1_i32 = arith.constant 1 : i32
    %43 = vector.broadcast %c1_i32 : i32 to vector<8x128xi32>
    %44 = arith.cmpi eq, %42, %43 : vector<8x128xi32>
    %45 = arith.select %44, %6, %3 : vector<8x128xi1>, vector<8x128xf32>
    %c2_i32 = arith.constant 2 : i32
    %46 = vector.broadcast %c2_i32 : i32 to vector<8x128xi32>
    %47 = arith.cmpi eq, %42, %46 : vector<8x128xi32>
    %48 = arith.select %47, %9, %45 : vector<8x128xi1>, vector<8x128xf32>
    %c3_i32 = arith.constant 3 : i32
    %49 = vector.broadcast %c3_i32 : i32 to vector<8x128xi32>
    %50 = arith.cmpi eq, %42, %49 : vector<8x128xi32>
    %51 = arith.select %50, %12, %48 : vector<8x128xi1>, vector<8x128xf32>
    %c4_i32 = arith.constant 4 : i32
    %52 = vector.broadcast %c4_i32 : i32 to vector<8x128xi32>
    %53 = arith.cmpi eq, %42, %52 : vector<8x128xi32>
    %54 = arith.select %53, %15, %51 : vector<8x128xi1>, vector<8x128xf32>
    %c5_i32 = arith.constant 5 : i32
    %55 = vector.broadcast %c5_i32 : i32 to vector<8x128xi32>
    %56 = arith.cmpi eq, %42, %55 : vector<8x128xi32>
    %57 = arith.select %56, %18, %54 : vector<8x128xi1>, vector<8x128xf32>
    %c6_i32 = arith.constant 6 : i32
    %58 = vector.broadcast %c6_i32 : i32 to vector<8x128xi32>
    %59 = arith.cmpi eq, %42, %58 : vector<8x128xi32>
    %60 = arith.select %59, %21, %57 : vector<8x128xi1>, vector<8x128xf32>
    %c7_i32 = arith.constant 7 : i32
    %61 = vector.broadcast %c7_i32 : i32 to vector<8x128xi32>
    %62 = arith.cmpi eq, %42, %61 : vector<8x128xi32>
    %63 = arith.select %62, %24, %60 : vector<8x128xi1>, vector<8x128xf32>
    %c8_i32_2 = arith.constant 8 : i32
    %64 = vector.broadcast %c8_i32_2 : i32 to vector<8x128xi32>
    %65 = arith.cmpi eq, %42, %64 : vector<8x128xi32>
    %66 = arith.select %65, %27, %63 : vector<8x128xi1>, vector<8x128xf32>
    %c9_i32 = arith.constant 9 : i32
    %67 = vector.broadcast %c9_i32 : i32 to vector<8x128xi32>
    %68 = arith.cmpi eq, %42, %67 : vector<8x128xi32>
    %69 = arith.select %68, %30, %66 : vector<8x128xi1>, vector<8x128xf32>
    %c10_i32 = arith.constant 10 : i32
    %70 = vector.broadcast %c10_i32 : i32 to vector<8x128xi32>
    %71 = arith.cmpi eq, %42, %70 : vector<8x128xi32>
    %72 = arith.select %71, %33, %69 : vector<8x128xi1>, vector<8x128xf32>
    %c11_i32 = arith.constant 11 : i32
    %73 = vector.broadcast %c11_i32 : i32 to vector<8x128xi32>
    %74 = arith.cmpi eq, %42, %73 : vector<8x128xi32>
    %75 = arith.select %74, %36, %72 : vector<8x128xi1>, vector<8x128xf32>
    %76 = arith.index_cast %38 : i32 to index
    %c0_3 = arith.constant 0 : index
    %77 = vector.load %arg3[%76, %c0_3] : memref<8x128xf32, #tpu.memory_space<vmem>>, vector<8x128xf32>
    tpu.vector_store %arg3[%76, %c0_3], %75 {strides = array<i32>} : memref<8x128xf32, #tpu.memory_space<vmem>>, vector<8x128xf32>,
    %c1_i32_4 = arith.constant 1 : i32
    return
  }
  func.func @transform_0(%arg0: i32) -> (i32, i32) {
    %c0_i32 = arith.constant 0 : i32
    %c0_i32_0 = arith.constant 0 : i32
    return %arg0, %c0_i32 : i32, i32
  }
  func.func @transform_1(%arg0: i32) -> (i32, i32) {
    %c0_i32 = arith.constant 0 : i32
    %c0_i32_0 = arith.constant 0 : i32
    %c0_i32_1 = arith.constant 0 : i32
    return %c0_i32, %c0_i32_0 : i32, i32
  }
  func.func @transform_2(%arg0: i32) -> (i32, i32) {
    %c0_i32 = arith.constant 0 : i32
    %c0_i32_0 = arith.constant 0 : i32
    return %arg0, %c0_i32 : i32, i32
  }
}

</mosaic_0001>

<bundles_post_ra>
// kernel: constraint_embedding_forward.1
= control target key start
LH: loop header
LB: loop body
LE: loop exit
PB: predicated region body
PF: predicated region fallthrough
CT: control target
= control target key end

     0   :  { %7 = vsyncpa [#allocation3], 0  ;;  %s534_s0 = inlined_call_operand.vmem [shape: s32[16,1], index: 0, kind: input, shape index: {}]   ;;  %s535_s1 = inlined_call_operand.vmem [shape: f32[12,128], index: 1, kind: input, shape index: {}]   ;;  %s536_s2 = inlined_call_operand.hbm [shape: f32[16,128], index: 2, kind: output, shape index: {}]  }
   0x1   :  { %9 = vsyncpa [#allocation3 + $0x1], 0  ;;  %s421_s9 = smov 0   ;;  %s423_s10 = smov 0  }
   0x2   :  { %s425_s11 = smov 0   ;;  %s427_s12 = smov 0  }
   0x3 LB: > { %s442_s13 = sadd.s32 4294967295, %s402_s12   ;;  %s289_s14 = sadd.s32 4294967294, %s402_s12   ;;  %s402_s12 = sphi %s427_s12, %s542_s12   ;;  %s398_s11 = sphi %s425_s11, %s541_s11   ;;  %s394_s10 = sphi %s423_s10, %s540_s10   ;;  %s390_s9 = sphi %s421_s9, %s539_s9  }
   0x4   : > { %s446_s15 = sadd.s32 1, %s402_s12   ;;  %s69_s16 = sadd.s32 1, %s398_s11 }
   0x5   : > { %s66_s17 = ssub.s32 %s402_s12, %s446_s15  ;;  %p79_p0 = scmp.ne.s32.totalorder %s398_s11, %s394_s10 }
   0x6   : > { %p67_p1 = scmp.eq.s32.totalorder %s66_s17, 0  ;;  %p80_p2 = scmp.eq.s32.totalorder %s442_s13, 1 }
   0x7   : > { %p85_p3 = scmp.ne.s32.totalorder %s394_s10, %s390_s9  ;;  %p86_p4 = scmp.eq.s32.totalorder %s289_s14, 1 }
   0x8   : > { %s457_s18 = scalar_select %p67_p1, %s398_s11, %s69_s16  }
   0x9   : > { %p459_p5 = por %p80_p2, %p79_p0  ;;  %p463_p6 = por %p86_p4, %p85_p3 }
   0xa   : > { %p292_p7 = scmp.ge.s32.totalorder %s402_s12, 1  ;;  %p114_p8 = scmp.lt.s32.totalorder %s402_s12, 3 }
   0xc   : > { %p115_p9 = pnand %p292_p7, %p114_p8 }
   0xd   : > { %p135_p10 = scmp.lt.s32.totalorder (!%p115_p9), %s442_s13, 1  ;;  %v404_v0 = vmov (!%p115_p9), 0   ;;  %v141_v2 = vlaneseq (!%p115_p9)  ;;  %v139_v6 = vld [vmem:[%s535_s1] sm:$0xff] (!%p115_p9)  ;;  %s132_s28 = sand.u32 (!%p115_p9), 1, %s394_s10   ;;  %v140_v19 = vld [vmem:[%s535_s1 + $0x8] sm:$0xf] (!%p115_p9) }
   0xe   : > { %118 = sbr.rel (%p115_p9) target bundleno = 180 (0xb4), region = 28  ;;  %339 = vset.pattern.permute.xlu0 (!%p115_p9), %v404_v0  ;;  %s480_s29 = sshll.u32 (!%p115_p9), %s132_s28, 3 }
   0xf   : > { %v142_v3 = vshrl.u32 (!%p115_p9), %v141_v2, 7  ;;  %s296_s4 = sshll.u32 (!%p115_p9), %s442_s13, 7  ;;  %s134_s5 = scalar_lea.vmem (!%p115_p9), [#allocation2], %s480_s29 }
  0x10   : > { %s230_s6 = sshll.u32 (!%p115_p9), %s134_s5, 4  ;;  %s490_s14 = scalar_lea.hbm (!%p115_p9), %s536_s2, %s296_s4  ;;  %s492_s6 = int_to_ptr.vmem [resolvable:$true] %s230_s6 }
  0x11   : > { %v143_v4 = vsub.s32 (!%p115_p9), 0, %v142_v3  ;;  %v147_v5 = vsub.s32 (!%p115_p9), 1, %v142_v3  ;;  %v151_v7 = vsub.s32 (!%p115_p9), 2, %v142_v3  ;;  %v155_v8 = vsub.s32 (!%p115_p9), 3, %v142_v3  ;;  %s340_s16 = scalar_lea.vmem (!%p115_p9), %s492_s6, 128  ;;  %s405_s17 = smov (!%p115_p9), [#allocation2]  }
  0x12   : > { %v159_v9 = vsub.s32 (!%p115_p9), 4, %v142_v3  ;;  %v163_v12 = vsub.s32 (!%p115_p9), 5, %v142_v3  ;;  %v167_v14 = vsub.s32 (!%p115_p9), 6, %v142_v3  ;;  %v171_v17 = vsub.s32 (!%p115_p9), 7, %v142_v3  ;;  %p341_p11 = scmp.ne.s32.totalorder (!%p115_p9), %s492_s6, %s340_s16 }
  0x13   : > { %v144_v10 = vrot.slane (!%p115_p9), %v139_v6, %v143_v4  ;;  %v148_v11 = vrot.slane (!%p115_p9), %v139_v6, %v147_v5  ;;  %v152_v13 = vrot.slane (!%p115_p9), %v139_v6, %v151_v7  ;;  %v156_v16 = vrot.slane (!%p115_p9), %v139_v6, %v155_v8 }
  0x14   : > { %v160_v18 = vrot.slane (!%p115_p9), %v139_v6, %v159_v9  ;;  %v164_v20 = vrot.slane (!%p115_p9), %v139_v6, %v163_v12  ;;  %v168_v22 = vrot.slane (!%p115_p9), %v139_v6, %v167_v14  ;;  %v172_v24 = vrot.slane (!%p115_p9), %v139_v6, %v171_v17  ;;  %p342_p12 = pnand (!%p115_p9), %p341_p11, %p459_p5 }
  0x15   : > { %s136_s21 = scalar_select %p135_p10, %s442_s13, 1  ;;  %v176_v26 = vrot.slane %v140_v19, %v143_v4  ;;  %v180_v28 = vrot.slane %v140_v19, %v147_v5  ;;  %v184_v30 = vrot.slane %v140_v19, %v151_v7  ;;  %v188_v32 = vrot.slane %v140_v19, %v155_v8 }
  0x16   : > { %s217_s13 = scalar_lea.sflag [#allocation3], %s132_s28  ;;  %p343_p13 = pneg %p342_p12 }
  0x17   : > { %s294_s22 = sshll.u32 %s136_s21, 3  ;;  %s344_s21 = sshll.u32 %s405_s17, 4  ;;  %s345_s21 = int_to_ptr.vmem [resolvable:$false] %s344_s21 }
  0x18   : > { %s138_s25 = scalar_lea.vmem %s534_s0, %s294_s22  ;;  %s346_s22 = scalar_lea.vmem %s345_s21, 256 }
  0x19   : > { %v189_v1 = vld [vmem:[%s138_s25] sm:$0xff]  ;;  %p347_p0 = scmp.lt.s32.totalorder %s492_s6, %s345_s21  ;;  %p348_p1 = scmp.lt.s32.totalorder %s346_s22, %s340_s16 }
  0x1a   : > { %191 = vperm.xlu0 %339, %v189_v1  }
  0x1b   : > { %p349_p2 = por %p348_p1, %p347_p0 }
  0x1d   : > { %p350_p3 = pnand %p349_p2, %p343_p13 }
  0x99   : > { %v192_v15 = vpop.permute.xlu0 %191 }
  0x9a   : > { %vm193_vm0 = vcmp.eq.s32.totalorder %v192_v15, 1  ;;  %vm195_vm1 = vcmp.eq.s32.totalorder %v192_v15, 2  ;;  %vm197_vm2 = vcmp.eq.s32.totalorder %v192_v15, 3  ;;  %vm199_vm3 = vcmp.eq.s32.totalorder %v192_v15, 4 }
  0x9b   : > { %v194_v21 = vsel %vm193_vm0, %v148_v11, %v144_v10  ;;  %vm201_vm4 = vcmp.eq.s32.totalorder %v192_v15, 5  ;;  %vm203_vm5 = vcmp.eq.s32.totalorder %v192_v15, 6  ;;  %vm205_vm6 = vcmp.eq.s32.totalorder %v192_v15, 7 }
  0x9c   : > { %v196_v23 = vsel %vm195_vm1, %v152_v13, %v194_v21  ;;  %vm207_vm7 = vcmp.eq.s32.totalorder %v192_v15, 8  ;;  %vm209_vm8 = vcmp.eq.s32.totalorder %v192_v15, 9  ;;  %vm211_vm9 = vcmp.eq.s32.totalorder %v192_v15, 10 }
  0x9d   : > { %v198_v25 = vsel %vm197_vm2, %v156_v16, %v196_v23  ;;  %vm213_vm10 = vcmp.eq.s32.totalorder %v192_v15, 11 }
  0x9e   : > { %v200_v27 = vsel %vm199_vm3, %v160_v18, %v198_v25 }
  0x9f   : > { %v202_v29 = vsel %vm201_vm4, %v164_v20, %v200_v27 }
  0xa0   : > { %v204_v31 = vsel %vm203_vm5, %v168_v22, %v202_v29 }
  0xa1   : > { %v206_v33 = vsel %vm205_vm6, %v172_v24, %v204_v31 }
  0xa2   : > { %v208_v34 = vsel %vm207_vm7, %v176_v26, %v206_v33 }
  0xa3   : > { %v210_v35 = vsel %vm209_vm8, %v180_v28, %v208_v34 }
  0xa4   : > { %v212_v36 = vsel %vm211_vm9, %v184_v30, %v210_v35 }
  0xa5   : > { %v214_v37 = vsel %vm213_vm10, %v188_v32, %v212_v36 }
  0xa6   : > { %215 = vst [vmem:[%s134_s5] sm:$0xff] %v214_v37 }
  0xa7   : > { %353 = shalt.err (!%p350_p3)
}
  0xa8   : > { %s354_s23 = scalar_lea.hbm %s490_s14, 128  ;;  %s358_s26 = scalar_lea.hbm %s536_s2, 256 }
  0xa9   : > { %p355_p4 = scmp.ne.s32.totalorder %s490_s14, %s354_s23  ;;  %p359_p9 = scmp.lt.u32.totalorder %s490_s14, %s536_s2 }
  0xaa   : > { %p360_p10 = scmp.lt.u32.totalorder %s358_s26, %s354_s23  ;;  %p362_p12 = scmp.lt.u32.totalorder %s354_s23, %s490_s14 }
  0xab   : > { %p356_p7 = pnand %p355_p4, %p459_p5 }
  0xac   : > { %p361_p11 = por %p360_p10, %p359_p9 }
  0xad   : > { %p357_p8 = pneg %p356_p7 }
  0xae   : > { %p363_p13 = por %p362_p12, %p361_p11 }
  0xb0   : > { %p364_p0 = pnand %p363_p13, %p357_p8 }
  0xb2   : > { %367 = shalt.err (!%p364_p0)
}
  0xb3   : > { %299 = dma.vmem_to_hbm [thread:$0]  (%p459_p5), %s492_s6, 128, %s490_s14, %s217_s13  }
  0xb4 PF: > { %p305_p1 = scmp.ge.s32.totalorder %s402_s12, 2  ;;  %s242_s29 = sand.u32 1, %s390_s9  }
  0xb5   : > { %s243_s30 = scalar_lea.sflag [#allocation3], %s242_s29 }
  0xb6   : > { %p302_p2 = pnand %p305_p1, %p463_p6 }
  0xb8   : > { %385 = dma.done.wait (!%p302_p2), %s243_s30, 128  }
  0xb9   : > { %387 = vsyncadd (!%p302_p2), %s243_s30, 4294967168  ;;  %p12_p3 = scmp.ge.s32.totalorder %s446_s15, 4   ;;  %s539_s9 = smov %s394_s10 }
  0xba   : > { %s540_s10 = smov %s398_s11  ;;  %s541_s11 = smov %s457_s18 }
  0xbb   : > { %s542_s12 = smov %s446_s15  ;;  %14 = sbr.rel (!%p12_p3) target bundleno = 3 (0x3), region = 63 }
  0xc2   :  { %248 = vsyncpa [#allocation3], 1 }
  0xc3   :  { %250 = vsyncpa [#allocation3 + $0x1], 1 }

</bundles_post_ra>
